<compile_context>
chip_gen: v7x
topology: tpu7x:2x2x1
jax: 0.10.0
libtpu: 0.0.40
codegen_flags: <defaults>
</compile_context>

<pallas_src>
import jax
import jax.numpy as jnp
from jax.experimental import pallas as pl
from jax.experimental.pallas import tpu as pltpu

EPS = 1e-5
_TM_MAX = 1024


def _round_up(x, m):
    return ((x + m - 1) // m) * m


def _vmem_capacity_bytes():
    """Physical VMEM capacity for this chip (conservative fallback = 64 MiB)."""
    try:
        info = pltpu.get_tpu_info()
        cap = getattr(info, "vmem_capacity_bytes", None)
        if cap:
            return int(cap)
    except Exception:
        pass
    return 64 * 2**20


def _make_kernel(has_residual, d_real, d_pad):
    """Fused Add -> LayerNorm -> Linear-mixer kernel (2D grid: rows x out-cols)."""
    needs_mask = (d_pad != d_real)
    inv_d = 1.0 / float(d_real)

    def kernel(*refs):
        if has_residual:
            h_ref, r_ref, gamma_ref, w_ref, beff_ref, out_ref, res_out_ref, ln_ref = refs
        else:
            h_ref, gamma_ref, w_ref, beff_ref, out_ref, res_out_ref, ln_ref = refs
            r_ref = None

        n = pl.program_id(1)

        # Add + LayerNorm once per row tile; result cached in VMEM scratch and
        # reused for every output-column panel.
        @pl.when(n == 0)
        def _():
            resid = h_ref[...].astype(jnp.float32)
            if has_residual:
                resid = resid + r_ref[...].astype(jnp.float32)
            # Store the residual stream immediately after the add (spreads the
            # f32 store across the iteration; frees vregs/VMEM earlier).
            res_out_ref[...] = resid.astype(res_out_ref.dtype)

            # LayerNorm statistics over the true feature dim (padding lanes
            # of the inputs are zero, so the mean is exact).
            mean = jnp.sum(resid, axis=-1, keepdims=True) * inv_d
            cent = resid - mean
            if needs_mask:
                lane = jax.lax.broadcasted_iota(jnp.int32, cent.shape, 1)
                cent_v = jnp.where(lane < d_real, cent, 0.0)
            else:
                cent_v = cent
            var = jnp.sum(cent_v * cent_v, axis=-1, keepdims=True) * inv_d
            inv = jax.lax.rsqrt(var + EPS)

            # gamma is zero-padded, so padded lanes of `ln` are exactly 0.
            ln = cent * (inv * gamma_ref[...].astype(jnp.float32))
            ln_ref[...] = ln.astype(ln_ref.dtype)

        # Mixer hot path: bf16 x bf16 on the MXU, f32 accumulation.
        mixed = jnp.dot(ln_ref[...], w_ref[...], preferred_element_type=jnp.float32)
        # Effective bias = beta @ W + b_mix (folded in the wrapper, in f32).
        out_ref[...] = (mixed + beff_ref[...].astype(jnp.float32)).astype(out_ref.dtype)

    return kernel


def _plan(M, D, in_bytes, out_bytes, res_bytes, has_residual, force_tn=None):
    """Choose (Dp, Np, tm, tn, n_col, Mpad, vmem_limit) from the chip's VMEM."""
    Dp = max(128, _round_up(D, 128))          # lane-dense feature dim
    vmem_cap = _vmem_capacity_bytes()
    budget = (vmem_cap * 3) // 4              # ~48 MiB v7x, ~96 MiB v5e/v6e

    # ---- output-column panel (weight streaming for large D) ----
    if force_tn is not None:
        tn = max(128, _round_up(min(int(force_tn), Dp), 128))
    elif Dp * Dp * 2 <= budget // 3:
        # Single-buffered bf16 weight fits comfortably -> keep it resident.
        tn = Dp
    else:
        tn = min(Dp, 512)
        while tn > 128 and 2 * Dp * tn * 2 > budget // 3:
            tn -= 128
    n_col = int(pl.cdiv(Dp, tn))
    Np = n_col * tn
    w_bufs = 1 if n_col == 1 else 2           # single-buffer the constant weight

    # Fixed (grid-invariant) VMEM: weight panel(s), gamma, effective bias.
    fixed = w_bufs * Dp * tn * 2 + Dp * 4 + w_bufs * tn * 4

    # Per-row-of-tm streamed / scratch / temporary bytes.
    n_in = 2 if has_residual else 1
    per_row = (
        2 * Dp * in_bytes * n_in      # double-buffered row inputs
        + 2 * tn * out_bytes          # double-buffered mixer-output panel
        + 2 * Dp * res_bytes          # residual-stream output block
        + Dp * 2                      # ln scratch (bf16)
        + 4 * Dp * 4 + tn * 4         # f32 intermediates inside the kernel body
    )

    avail = max(budget - fixed, 8 * per_row)
    tm_cap = min(_TM_MAX, avail // per_row)
    m_pad8 = _round_up(M, 8)
    if m_pad8 <= tm_cap:
        tm = m_pad8                            # whole problem in one row tile
    else:
        tm = int(tm_cap)
        # MXU-friendly alignment: 256 for v6e/v7x (2x256x256); 8 otherwise.
        tm -= tm % (256 if tm >= 256 else 8)
        tm = max(8, tm)
    Mpad = int(pl.cdiv(M, tm)) * tm

    need = fixed + tm * per_row
    vmem_limit = int(min(vmem_cap - (8 << 20), need + (8 << 20)))
    vmem_limit = max(vmem_limit, 16 << 20)
    return Dp, Np, tm, tn, n_col, Mpad, vmem_limit


def block_forward(hidden_states, residual, gamma, beta, w_mix, b_mix,
                  *, residual_in_fp32=True, _force_tn=None):
    """Pallas version of Block.forward (fused_add_norm=False path).

    hidden_states: (B, L, D); residual: (B, L, D) or None.
    Returns (hidden_out, residual_out), both (B, L, D).
    """
    B, L, D = hidden_states.shape
    M = B * L
    in_dtype = hidden_states.dtype
    out_dtype = in_dtype
    res_dtype = jnp.float32 if residual_in_fp32 else in_dtype
    has_residual = residual is not None

    in_bytes = jnp.dtype(in_dtype).itemsize
    out_bytes = jnp.dtype(out_dtype).itemsize
    res_bytes = jnp.dtype(res_dtype).itemsize

    Dp, Np, tm, tn, n_col, Mpad, vmem_limit = _plan(
        M, D, in_bytes, out_bytes, res_bytes, has_residual, force_tn=_force_tn)

    # ---- wrapper-side layout prep (pad to lane/sublane-friendly shapes) ----
    def _pad2(x2d, rows, cols):
        r0, c0 = x2d.shape
        if rows == r0 and cols == c0:
            return x2d
        return jnp.pad(x2d, ((0, rows - r0), (0, cols - c0)))

    h2 = _pad2(hidden_states.reshape(M, D), Mpad, Dp)
    args = [h2]
    if has_residual:
        args.append(_pad2(residual.reshape(M, D), Mpad, Dp))

    gamma_p = jnp.pad(gamma.astype(jnp.float32), (0, Dp - D)).reshape(1, Dp)
    # Fold LN beta into the mixer bias:
    #   (x_hat*gamma + beta) @ W + b == (x_hat*gamma) @ W + (beta @ W + b)
    b_eff = (beta.astype(jnp.float32) @ w_mix.astype(jnp.float32)
             + b_mix.astype(jnp.float32))
    b_eff_p = jnp.pad(b_eff, (0, Np - D)).reshape(1, Np)
    w_p = _pad2(w_mix, Dp, Np).astype(jnp.bfloat16)
    args += [gamma_p, w_p, b_eff_p]

    kernel = _make_kernel(has_residual, D, Dp)

    row_in_spec = pl.BlockSpec((tm, Dp), lambda i, n: (i, 0))
    gamma_spec = pl.BlockSpec((1, Dp), lambda i, n: (0, 0),
                              pipeline_mode=pl.Buffered(1))
    if n_col == 1:
        # Constant across the whole grid -> single buffer (no wasted copy).
        w_spec = pl.BlockSpec((Dp, tn), lambda i, n: (0, 0),
                              pipeline_mode=pl.Buffered(1))
        beff_spec = pl.BlockSpec((1, tn), lambda i, n: (0, 0),
                                 pipeline_mode=pl.Buffered(1))
    else:
        # Streamed column panels -> default double buffering.
        w_spec = pl.BlockSpec((Dp, tn), lambda i, n: (0, n))
        beff_spec = pl.BlockSpec((1, tn), lambda i, n: (0, n))
    out_spec = pl.BlockSpec((tm, tn), lambda i, n: (i, n))
    res_out_spec = pl.BlockSpec((tm, Dp), lambda i, n: (i, 0))

    in_specs = [row_in_spec]
    if has_residual:
        in_specs.append(row_in_spec)
    in_specs += [gamma_spec, w_spec, beff_spec]

    grid = (Mpad // tm, n_col)

    out, res_out = pl.pallas_call(
        kernel,
        out_shape=(
            jax.ShapeDtypeStruct((Mpad, Np), out_dtype),
            jax.ShapeDtypeStruct((Mpad, Dp), res_dtype),
        ),
        grid_spec=pltpu.PrefetchScalarGridSpec(
            num_scalar_prefetch=0,
            grid=grid,
            in_specs=in_specs,
            out_specs=[out_spec, res_out_spec],
            scratch_shapes=[pltpu.VMEM((tm, Dp), jnp.bfloat16)],   # cached LN(x)
        ),
        compiler_params=pltpu.CompilerParams(
            dimension_semantics=("parallel", "arbitrary"),
            vmem_limit_bytes=vmem_limit),
    )(*args)

    # Skip the slice entirely for well-shaped (un-padded) production sizes.
    if Mpad != M or Np != D:
        out = out[:M, :D]
    if Mpad != M or Dp != D:
        res_out = res_out[:M, :D]
    return out.reshape(B, L, D), res_out.reshape(B, L, D)


def _reference(hidden_states, residual, gamma, beta, w_mix, b_mix):
    resid = hidden_states if residual is None else hidden_states + residual
    resid = resid.astype(jnp.float32)
    mean = jnp.mean(resid, axis=-1, keepdims=True)
    var = jnp.mean((resid - mean) ** 2, axis=-1, keepdims=True)
    ln = (resid - mean) * jax.lax.rsqrt(var + EPS) * gamma + beta
    mixed = jnp.einsum("bld,de->ble", ln, w_mix) + b_mix
    return mixed, resid


def _check(B, L, D, key, with_residual, force_tn=None):
    k1, k2, k3, k4, k5, k6 = jax.random.split(key, 6)
    hidden = jax.random.normal(k1, (B, L, D), dtype=jnp.float32)
    residual = (jax.random.normal(k2, (B, L, D), dtype=jnp.float32)
                if with_residual else None)

    # Synthetic parameters.  The mixer is a dense dim->dim linear; the real
    # Mamba mixer (selective scan) would replace this matmul.
    gamma = 1.0 + 0.1 * jax.random.normal(k3, (D,), dtype=jnp.float32)
    beta = 0.1 * jax.random.normal(k4, (D,), dtype=jnp.float32)
    w_mix = jax.random.normal(k5, (D, D), dtype=jnp.float32) / jnp.sqrt(D)
    b_mix = 0.01 * jax.random.normal(k6, (D,), dtype=jnp.float32)

    out, res_out = block_forward(hidden, residual, gamma, beta, w_mix, b_mix,
                                 _force_tn=force_tn)
    jax.block_until_ready((out, res_out))

    ref_out, ref_res = _reference(hidden, residual, gamma, beta, w_mix, b_mix)
    # Mixer matmul uses bf16 operands (f32 accumulation) -> looser tolerance.
    assert jnp.allclose(out, ref_out, atol=5e-2, rtol=5e-2), "mixer output mismatch"
    # Residual stream is exact f32.
    assert jnp.allclose(res_out, ref_res, atol=1e-5, rtol=1e-5), "residual mismatch"


if __name__ == "__main__":
    key = jax.random.PRNGKey(0)
    k_a, k_b, k_c, k_d = jax.random.split(key, 4)

    # Small shapes implied by the forward: batch=2, seq=8, hidden dim=32.
    _check(2, 8, 32, k_a, with_residual=True)    # standard Add->LN->Mixer path
    _check(2, 8, 32, k_b, with_residual=False)   # first-block (residual=None) path
    # Exercise row- and lane-padding paths (M=10 rows, D=96 -> padded to 128).
    _check(2, 5, 96, k_c, with_residual=True)
    # Exercise the column-tiled (weight streaming) path used for large D by
    # forcing tn=128 at D=384 (3 output-column panels).
    _check(2, 8, 384, k_d, with_residual=True, force_tn=128)

    print("KERNEL_OK")
</pallas_src>

<mosaic_0001>
module attributes {stable_mosaic.version = 11 : i64} {
  func.func @kernel(%arg0: i32, %arg1: i32, %arg2: memref<16x128xf32, #tpu.memory_space<vmem>>, %arg3: memref<16x128xf32, #tpu.memory_space<vmem>>, %arg4: memref<1x128xf32, #tpu.memory_space<vmem>>, %arg5: memref<128x128xbf16, #tpu.memory_space<vmem>>, %arg6: memref<1x128xf32, #tpu.memory_space<vmem>>, %arg7: memref<16x128xf32, #tpu.memory_space<vmem>>, %arg8: memref<16x128xf32, #tpu.memory_space<vmem>>, %arg9: memref<16x128xbf16, #tpu.memory_space<vmem>>) attributes {dimension_semantics = [#tpu.dimension_semantics<parallel>, #tpu.dimension_semantics<arbitrary>], iteration_bounds = array<i64: 1, 1>, scalar_prefetch = 0 : i64, scratch_operands = 1 : i64, tpu.core_type = #tpu.core_type<tc>, window_params = [{transform_indices = @transform_0, window_bounds = array<i64: 16, 128>}, {transform_indices = @transform_1, window_bounds = array<i64: 16, 128>}, {pipeline_mode = #tpu.pipeline_mode<synchronous>, transform_indices = @transform_2, window_bounds = array<i64: 1, 128>}, {pipeline_mode = #tpu.pipeline_mode<synchronous>, transform_indices = @transform_3, window_bounds = array<i64: 128, 128>}, {pipeline_mode = #tpu.pipeline_mode<synchronous>, transform_indices = @transform_4, window_bounds = array<i64: 1, 128>}, {transform_indices = @transform_5, window_bounds = array<i64: 16, 128>}, {transform_indices = @transform_6, window_bounds = array<i64: 16, 128>}]} {
    %c0_i32 = arith.constant 0 : i32
    %0 = arith.cmpi eq, %arg1, %c0_i32 : i32
    %1 = arith.extui %0 : i1 to i32
    %c0_i32_0 = arith.constant 0 : i32
    %2 = arith.cmpi ne, %1, %c0_i32_0 : i32
    scf.if %2 {
      %c0_8 = arith.constant 0 : index
      %c0_9 = arith.constant 0 : index
      %10 = vector.load %arg2[%c0_8, %c0_9] : memref<16x128xf32, #tpu.memory_space<vmem>>, vector<16x128xf32>
      %c0_10 = arith.constant 0 : index
      %c0_11 = arith.constant 0 : index
      %11 = vector.load %arg3[%c0_10, %c0_11] : memref<16x128xf32, #tpu.memory_space<vmem>>, vector<16x128xf32>
      %12 = arith.addf %10, %11 : vector<16x128xf32>
      %c0_12 = arith.constant 0 : index
      %c0_13 = arith.constant 0 : index
      %13 = vector.load %arg8[%c0_12, %c0_13] : memref<16x128xf32, #tpu.memory_space<vmem>>, vector<16x128xf32>
      tpu.vector_store %arg8[%c0_12, %c0_13], %12 {strides = array<i32>} : memref<16x128xf32, #tpu.memory_space<vmem>>, vector<16x128xf32>,
      %cst_14 = arith.constant dense<0.000000e+00> : vector<16xf32>
      %14 = vector.multi_reduction <add>, %12, %cst_14 [1] : vector<16x128xf32> to vector<16xf32>
      %15 = vector.shape_cast %14 : vector<16xf32> to vector<16x1xf32>
      %cst_15 = arith.constant 3.125000e-02 : f32
      %16 = vector.broadcast %cst_15 : f32 to vector<16x1xf32>
      %17 = arith.mulf %15, %16 : vector<16x1xf32>
      %18 = vector.broadcast %17 : vector<16x1xf32> to vector<16x128xf32>
      %19 = arith.subf %12, %18 : vector<16x128xf32>
      %20 = tpu.iota {dimensions = array<i32: 1>} : vector<16x128xi32>
      %c32_i32 = arith.constant 32 : i32
      %21 = vector.broadcast %c32_i32 : i32 to vector<16x128xi32>
      %22 = arith.cmpi slt, %20, %21 : vector<16x128xi32>
      %cst_16 = arith.constant 0.000000e+00 : f32
      %23 = vector.broadcast %cst_16 : f32 to vector<16x128xf32>
      %24 = arith.select %22, %19, %23 : vector<16x128xi1>, vector<16x128xf32>
      %25 = arith.mulf %24, %24 : vector<16x128xf32>
      %cst_17 = arith.constant dense<0.000000e+00> : vector<16xf32>
      %26 = vector.multi_reduction <add>, %25, %cst_17 [1] : vector<16x128xf32> to vector<16xf32>
      %27 = vector.shape_cast %26 : vector<16xf32> to vector<16x1xf32>
      %cst_18 = arith.constant 3.125000e-02 : f32
      %28 = vector.broadcast %cst_18 : f32 to vector<16x1xf32>
      %29 = arith.mulf %27, %28 : vector<16x1xf32>
      %cst_19 = arith.constant 9.99999974E-6 : f32
      %30 = vector.broadcast %cst_19 : f32 to vector<16x1xf32>
      %31 = arith.addf %29, %30 : vector<16x1xf32>
      %32 = math.rsqrt %31 : vector<16x1xf32>
      %c0_20 = arith.constant 0 : index
      %c0_21 = arith.constant 0 : index
      %33 = vector.load %arg4[%c0_20, %c0_21] : memref<1x128xf32, #tpu.memory_space<vmem>>, vector<1x128xf32>
      %34 = vector.broadcast %32 : vector<16x1xf32> to vector<16x128xf32>
      %35 = vector.broadcast %33 : vector<1x128xf32> to vector<16x128xf32>
      %36 = arith.mulf %34, %35 : vector<16x128xf32>
      %37 = arith.mulf %19, %36 : vector<16x128xf32>
      %38 = arith.truncf %37 : vector<16x128xf32> to vector<16x128xbf16>
      %c0_22 = arith.constant 0 : index
      %c0_23 = arith.constant 0 : index
      %39 = vector.load %arg9[%c0_22, %c0_23] : memref<16x128xbf16, #tpu.memory_space<vmem>>, vector<16x128xbf16>
      tpu.vector_store %arg9[%c0_22, %c0_23], %38 {strides = array<i32>} : memref<16x128xbf16, #tpu.memory_space<vmem>>, vector<16x128xbf16>,
    } else {
    }
    %c0 = arith.constant 0 : index
    %c0_1 = arith.constant 0 : index
    %3 = vector.load %arg9[%c0, %c0_1] : memref<16x128xbf16, #tpu.memory_space<vmem>>, vector<16x128xbf16>
    %c0_2 = arith.constant 0 : index
    %c0_3 = arith.constant 0 : index
    %4 = vector.load %arg5[%c0_2, %c0_3] : memref<128x128xbf16, #tpu.memory_space<vmem>>, vector<128x128xbf16>
    %cst = arith.constant dense<0.000000e+00> : vector<16x128xf32>
    %5 = tpu.matmul %3, %4, %cst {dimension_numbers = #tpu.dot_dimension_numbers<[1], [0], [0], [1], [0, 0, 1, 1], [], []>} : vector<16x128xbf16>, vector<128x128xbf16>, vector<16x128xf32> -> vector<16x128xf32>
    %c0_4 = arith.constant 0 : index
    %c0_5 = arith.constant 0 : index
    %6 = vector.load %arg6[%c0_4, %c0_5] : memref<1x128xf32, #tpu.memory_space<vmem>>, vector<1x128xf32>
    %7 = vector.broadcast %6 : vector<1x128xf32> to vector<16x128xf32>
    %8 = arith.addf %5, %7 : vector<16x128xf32>
    %c0_6 = arith.constant 0 : index
    %c0_7 = arith.constant 0 : index
    %9 = vector.load %arg7[%c0_6, %c0_7] : memref<16x128xf32, #tpu.memory_space<vmem>>, vector<16x128xf32>
    tpu.vector_store %arg7[%c0_6, %c0_7], %8 {strides = array<i32>} : memref<16x128xf32, #tpu.memory_space<vmem>>, vector<16x128xf32>,
    return
  }
  func.func @transform_0(%arg0: i32, %arg1: i32) -> (i32, i32) {
    %c0_i32 = arith.constant 0 : i32
    %c0_i32_0 = arith.constant 0 : i32
    return %arg0, %c0_i32 : i32, i32
  }
  func.func @transform_1(%arg0: i32, %arg1: i32) -> (i32, i32) {
    %c0_i32 = arith.constant 0 : i32
    %c0_i32_0 = arith.constant 0 : i32
    return %arg0, %c0_i32 : i32, i32
  }
  func.func @transform_2(%arg0: i32, %arg1: i32) -> (i32, i32) {
    %c0_i32 = arith.constant 0 : i32
    %c0_i32_0 = arith.constant 0 : i32
    %c0_i32_1 = arith.constant 0 : i32
    return %c0_i32, %c0_i32_0 : i32, i32
  }
  func.func @transform_3(%arg0: i32, %arg1: i32) -> (i32, i32) {
    %c0_i32 = arith.constant 0 : i32
    %c0_i32_0 = arith.constant 0 : i32
    %c0_i32_1 = arith.constant 0 : i32
    return %c0_i32, %c0_i32_0 : i32, i32
  }
  func.func @transform_4(%arg0: i32, %arg1: i32) -> (i32, i32) {
    %c0_i32 = arith.constant 0 : i32
    %c0_i32_0 = arith.constant 0 : i32
    %c0_i32_1 = arith.constant 0 : i32
    return %c0_i32, %c0_i32_0 : i32, i32
  }
  func.func @transform_5(%arg0: i32, %arg1: i32) -> (i32, i32) {
    %c0_i32 = arith.constant 0 : i32
    return %arg0, %arg1 : i32, i32
  }
  func.func @transform_6(%arg0: i32, %arg1: i32) -> (i32, i32) {
    %c0_i32 = arith.constant 0 : i32
    %c0_i32_0 = arith.constant 0 : i32
    return %arg0, %c0_i32 : i32, i32
  }
}

</mosaic_0001>

<bundles_post_ra>
// kernel: tpu_custom_call.1
= control target key start
LH: loop header
LB: loop body
LE: loop exit
PB: predicated region body
PF: predicated region fallthrough
CT: control target
= control target key end

     0   :  { %12 = vsyncpa [#allocation4], 0  ;;  %s576_s0 = inlined_call_operand.hbm [shape: f32[16,128], index: 0, kind: input, shape index: {}]   ;;  %s577_s1 = inlined_call_operand.hbm [shape: f32[16,128], index: 1, kind: input, shape index: {}]   ;;  %s578_s2 = inlined_call_operand.vmem [shape: f32[1,128], index: 2, kind: input, shape index: {}]   ;;  %s579_s3 = inlined_call_operand.hbm [shape: bf16[128,128], index: 3, kind: input, shape index: {}]   ;;  %s580_s4 = inlined_call_operand.vmem [shape: f32[1,128], index: 4, kind: input, shape index: {}]   ;;  %s581_s5 = inlined_call_operand.hbm [shape: f32[16,128], index: 5, kind: output, shape index: {0}]   ;;  %s582_s6 = inlined_call_operand.hbm [shape: f32[16,128], index: 6, kind: output, shape index: {1}]  }
   0x1   :  { %13 = vsyncpa [#allocation7], 0 }
   0x2   :  { %14 = vsyncpa [#allocation5], 0 }
   0x3   :  { %15 = vsyncpa [#allocation11], 0  ;;  %s445_s21 = smov [#allocation6]   ;;  %s446_s23 = smov [#allocation3]  }
   0x4   :  { %s33_s22 = sshll.u32 %s445_s21, 4  ;;  %s21_s24 = sshll.u32 %s446_s23, 4  ;;  %s34_s22 = int_to_ptr.vmem [resolvable:$true] %s33_s22  ;;  %s491_s24 = int_to_ptr.vmem [resolvable:$true] %s21_s24 }
   0x5   :  { %s327_s27 = scalar_lea.hbm %s577_s1, 256 }
   0x6   :  { %p328_p0 = scmp.ne.s32.totalorder %s577_s1, %s327_s27  ;;  %p331_p1 = scmp.lt.u32.totalorder %s327_s27, %s577_s1 }
   0x8   :  { %p333_p2 = pnand %p331_p1, %p328_p0 }
   0xa   :  { %336 = shalt.err (!%p333_p2)
}
   0xb   :  { %s337_s8 = scalar_lea.vmem %s34_s22, 256  ;;  %p342_p4 = scmp.lt.s32.totalorder %s34_s22, %s34_s22 }
   0xc   :  { %p338_p3 = scmp.ne.s32.totalorder %s34_s22, %s337_s8  ;;  %p343_p5 = scmp.lt.s32.totalorder %s337_s8, %s337_s8 }
   0xe   :  { %p344_p6 = por %p343_p5, %p342_p4 }
  0x10   :  { %p345_p7 = pnand %p344_p6, %p338_p3 }
  0x12   :  { %348 = shalt.err (!%p345_p7)
}
  0x13   :  { %s447_s9 = smov 128   ;;  %s448_s10 = smov 8  }
  0x14   :  { %39 = dma.hbm_to_vmem [thread:$0]  %s577_s1, 256, %s34_s22, [#allocation7], %s447_s9, %s447_s9, %s448_s10  }
  0x15   :  { %s349_s15 = scalar_lea.hbm %s576_s0, 256 }
  0x16   :  { %p350_p8 = scmp.ne.s32.totalorder %s576_s0, %s349_s15  ;;  %p353_p9 = scmp.lt.u32.totalorder %s349_s15, %s576_s0 }
  0x18   :  { %p355_p10 = pnand %p353_p9, %p350_p8 }
  0x1a   :  { %358 = shalt.err (!%p355_p10)
}
  0x1b   :  { %s359_s20 = scalar_lea.vmem %s491_s24, 256  ;;  %p364_p12 = scmp.lt.s32.totalorder %s491_s24, %s491_s24 }
  0x1c   :  { %p360_p11 = scmp.ne.s32.totalorder %s491_s24, %s359_s20  ;;  %p365_p13 = scmp.lt.s32.totalorder %s359_s20, %s359_s20 }
  0x1e   :  { %p366_p0 = por %p365_p13, %p364_p12 }
  0x20   :  { %p367_p1 = pnand %p366_p0, %p360_p11 }
  0x22   :  { %370 = shalt.err (!%p367_p1)
}
  0x23   :  { %27 = dma.hbm_to_vmem [thread:$0]  %s576_s0, 256, %s491_s24, [#allocation4], %s447_s9, %s447_s9, %s448_s10  }
  0x24   :  { %s449_s22 = smov [#allocation8]   ;;  %s371_s27 = scalar_lea.hbm %s579_s3, 1024 }
  0x25   :  { %s47_s23 = sshll.u32 %s449_s22, 4  ;;  %p372_p2 = scmp.ne.s32.totalorder %s579_s3, %s371_s27  ;;  %s48_s23 = int_to_ptr.vmem [resolvable:$true] %s47_s23 }
  0x26   :  { %p375_p3 = scmp.lt.u32.totalorder %s371_s27, %s579_s3 }
  0x28   :  { %p377_p4 = pnand %p375_p3, %p372_p2 }
  0x2a   :  { %380 = shalt.err (!%p377_p4)
}
  0x2b   :  { %s381_s8 = scalar_lea.vmem %s48_s23, 1024  ;;  %p386_p6 = scmp.lt.s32.totalorder %s48_s23, %s48_s23 }
  0x2c   :  { %p382_p5 = scmp.ne.s32.totalorder %s48_s23, %s381_s8  ;;  %p387_p7 = scmp.lt.s32.totalorder %s381_s8, %s381_s8 }
  0x2e   :  { %p388_p8 = por %p387_p7, %p386_p6 }
  0x30   :  { %p389_p9 = pnand %p388_p8, %p382_p5 }
  0x32   :  { %392 = shalt.err (!%p389_p9)
}
  0x33   :  { %s450_s0 = smov 64   ;;  %s451_s24 = smov 4  }
  0x34   :  { %53 = dma.hbm_to_vmem [thread:$0]  %s579_s3, 1024, %s48_s23, [#allocation7], %s450_s0, %s450_s0, %s451_s24  }
  0x35   :  { %437 = dma.done.wait [#allocation4], 256  }
  0x36   :  { %438 = vsyncadd [#allocation4], 4294967040 }
  0x37   :  { %439 = dma.done.wait [#allocation7], 1280  }
  0x38   :  { %440 = vsyncadd [#allocation7], 4294966016  ;;  %v70_v0 = vld [vmem:[#allocation3] sm:$0xff]  ;;  %v72_v1 = vld [vmem:[#allocation6] sm:$0xff]  ;;  %v452_v7 = vmov 0.0   ;;  %v86_v9 = vlaneseq  ;;  %vm453_vm1 = vmmov 0  }
  0x39   :  { %v71_v2 = vld [vmem:[#allocation3 + $0x8] sm:$0xff]  ;;  %v74_v3 = vadd.f32 %v72_v1, %v70_v0  ;;  %v73_v4 = vld [vmem:[#allocation6 + $0x8] sm:$0xff]  ;;  %v315_v6 = vld [vmem:[#allocation8] sm:$0xff]   ;;  %284 = vmatprep.subr.bf16.mxu0 %v452_v7  ;;  %300 = vmatprep.mubr.msk.bf16.mxu0 %vm453_vm1, %v452_v7  ;;  %s454_s14 = smov [#allocation10]  }
  0x3a   :  { %v75_v5 = vadd.f32 %v73_v4, %v71_v2  ;;  %285 = vmatpush3.bf16.msra.mxu0 %v315_v6  ;;  %v316_v8 = vld [vmem:[#allocation8 + $0x8] sm:$0xff]   ;;  %v87_v10 = vand.u32 127, %v86_v9  ;;  %v317_v21 = vld [vmem:[#allocation8 + $0x10] sm:$0xff]   ;;  %v318_v22 = vld [vmem:[#allocation8 + $0x18] sm:$0xff]   ;;  %s248_s15 = sshll.u32 %s454_s14, 4  ;;  %s249_s15 = int_to_ptr.vmem [resolvable:$true] %s248_s15 }
  0x3b   :  { %78 = vadd.xlane.f32.xlu0 %v74_v3  ;;  %76 = vst [vmem:[#allocation10] sm:$0xff] %v74_v3  ;;  %286 = vmatprep.subr.bf16.mxu0 %v452_v7  ;;  %v319_v23 = vld [vmem:[#allocation8 + $0x20] sm:$0xff]   ;;  %v320_v24 = vld [vmem:[#allocation8 + $0x28] sm:$0xff]   ;;  %v321_v25 = vld [vmem:[#allocation8 + $0x30] sm:$0xff]   ;;  %s393_s16 = scalar_lea.vmem %s249_s15, 256  ;;  %p398_p11 = scmp.lt.s32.totalorder %s249_s15, %s249_s15 }
  0x3c   :  { %77 = vst [vmem:[#allocation10 + $0x8] sm:$0xff] %v75_v5  ;;  %vm88_vm0 = vcmp.lt.s32.totalorder %v87_v10, 32  ;;  %v322_v26 = vld [vmem:[#allocation8 + $0x38] sm:$0xff]   ;;  %v265_v34 = vld [vmem:[%s578_s2] ss:$0 sm:$0xff]  ;;  %p394_p10 = scmp.ne.s32.totalorder %s249_s15, %s393_s16  ;;  %p399_p12 = scmp.lt.s32.totalorder %s393_s16, %s393_s16 }
  0x3e   :  { %287 = vmatpush3.bf16.msra.mxu0 %v316_v8  ;;  %p400_p13 = por %p399_p12, %p398_p11 }
  0x3f   :  { %80 = vadd.xlane.f32.xlu0 %v75_v5  ;;  %288 = vmatprep.subr.bf16.mxu0 %v452_v7 }
  0x40   :  { %p401_p0 = pnand %p400_p13, %p394_p10 }
  0x42   :  { %289 = vmatpush3.bf16.msra.mxu0 %v317_v21 }
  0x43   :  { %290 = vmatprep.subr.bf16.mxu0 %v452_v7 }
  0x46   :  { %291 = vmatpush3.bf16.msra.mxu0 %v318_v22 }
  0x47   :  { %292 = vmatprep.subr.bf16.mxu0 %v452_v7 }
  0x4a   :  { %293 = vmatpush3.bf16.msra.mxu0 %v319_v23 }
  0x4b   :  { %294 = vmatprep.subr.bf16.mxu0 %v452_v7 }
  0x4e   :  { %295 = vmatpush3.bf16.msra.mxu0 %v320_v24 }
  0x4f   :  { %296 = vmatprep.subr.bf16.mxu0 %v452_v7 }
  0x52   :  { %297 = vmatpush3.bf16.msra.mxu0 %v321_v25 }
  0x53   :  { %298 = vmatprep.subr.bf16.mxu0 %v452_v7 }
  0x56   :  { %299 = vmatpush3.bf16.msra.mxu0 %v322_v26 }
  0xc8   :  { %v79_v11 = vpop.xlane.xlu0 %78 }
  0xc9   :  { %v82_v12 = vmul.f32 0.03125, %v79_v11 }
  0xcb   :  { %v84_v13 = vsub.f32 %v74_v3, %v82_v12 }
  0xcc   :  { %v81_v14 = vpop.xlane.xlu0 %80 }
  0xcd   :  { %v83_v15 = vmul.f32 0.03125, %v81_v14  ;;  %v89_v16 = vsel %vm88_vm0, %v84_v13, 0.0 }
  0xce   :  { %v91_v17 = vmul.f32 %v89_v16, %v89_v16 }
  0xcf   :  { %v85_v18 = vsub.f32 %v75_v5, %v83_v15 }
  0xd0   :  { %93 = vadd.xlane.f32.xlu1 %v91_v17 }
  0xd1   :  { %v90_v19 = vsel %vm88_vm0, %v85_v18, 0.0 }
  0xd2   :  { %v92_v20 = vmul.f32 %v90_v19, %v90_v19 }
  0xd4   :  { %95 = vadd.xlane.f32.xlu1 %v92_v20 }
 0x15d   :  { %v94_v27 = vpop.xlane.xlu1 %93 }
 0x15e   :  { %v97_v28 = vmul.f32 0.03125, %v94_v27 }
 0x160   :  { %v99_v29 = vadd.f32 1e-05, %v97_v28 }
 0x161   :  { %v96_v30 = vpop.xlane.xlu1 %95 }
 0x162   :  { %323 = vrsqrt.f32 %v99_v29  ;;  %v98_v31 = vmul.f32 0.03125, %v96_v30 }
 0x164   :  { %v100_v32 = vadd.f32 1e-05, %v98_v31 }
 0x166   :  { %325 = vrsqrt.f32 %v100_v32 }
 0x16c   :  { %v324_v33 = vpop.eup %323 }
 0x16d   :  { %v110_v35 = vmul.f32 %v324_v33, %v265_v34 }
 0x16f   :  { %v112_v38 = vmul.f32 %v110_v35, %v84_v13 }
 0x170   :  { %v326_v36 = vpop.eup %325 }
 0x171   :  { %v111_v37 = vmul.f32 %v326_v36, %v265_v34 }
 0x173   :  { %v113_v39 = vmul.f32 %v111_v37, %v85_v18 }
 0x175   :  { %v114_v40 = vpack.c.bf16 %v113_v39, %v112_v38 }
 0x177   :  { %301 = vmatmul.mubr.bf16.vlgmr.msra.gmra.mrb[0].mxu0 %v114_v40 }
 0x178   :  { %404 = shalt.err (!%p401_p0)
}
 0x179   :  { %s405_s2 = scalar_lea.hbm %s582_s6, 256 }
 0x17a   :  { %p406_p1 = scmp.ne.s32.totalorder %s582_s6, %s405_s2  ;;  %p409_p2 = scmp.lt.u32.totalorder %s405_s2, %s582_s6 }
 0x17c   :  { %p411_p3 = pnand %p409_p2, %p406_p1 }
 0x17e   :  { %414 = shalt.err (!%p411_p3)
}
 0x17f   :  { %254 = dma.vmem_to_hbm [thread:$0]  %s249_s15, 256, %s582_s6, [#allocation11], %s447_s9, %s447_s9, %s448_s10  }
 0x180   :  { %v266_v41 = vld [vmem:[%s580_s4] ss:$0 sm:$0xff]  ;;  %s455_s27 = smov [#allocation9]  }
 0x181   :  { %s236_s28 = sshll.u32 %s455_s27, 4  ;;  %s237_s28 = int_to_ptr.vmem [resolvable:$true] %s236_s28 }
 0x182   :  { %s415_s29 = scalar_lea.vmem %s237_s28, 256  ;;  %p420_p5 = scmp.lt.s32.totalorder %s237_s28, %s237_s28 }
 0x183   :  { %p416_p4 = scmp.ne.s32.totalorder %s237_s28, %s415_s29  ;;  %p421_p6 = scmp.lt.s32.totalorder %s415_s29, %s415_s29 }
 0x185   :  { %p422_p7 = por %p421_p6, %p420_p5 }
 0x187   :  { %p423_p8 = pnand %p422_p7, %p416_p4 }
 0x24a   :  { %v222_v42 = vpop.f32.mrb[0].mxu0 }
 0x24b   :  { %v223_v43 = vadd.f32 %v266_v41, %v222_v42  ;;  %v302_v44 = vpop.f32.mrb[1].mxu0 }
 0x24c   :  { %v225_v45 = vpop.f32.mrb[2].mxu0 }
 0x24d   :  { %229 = vst [vmem:[#allocation9] sm:$0xff] %v223_v43  ;;  %v226_v46 = vadd.f32 %v266_v41, %v225_v45  ;;  %v303_v47 = vpop.f32.mrb[3].mxu0 }
 0x24f   :  { %230 = vst [vmem:[#allocation9 + $0x8] sm:$0xff] %v226_v46 }
 0x250   :  { %426 = shalt.err (!%p423_p8)
}
 0x251   :  { %s427_s30 = scalar_lea.hbm %s581_s5, 256 }
 0x252   :  { %p428_p9 = scmp.ne.s32.totalorder %s581_s5, %s427_s30  ;;  %p431_p10 = scmp.lt.u32.totalorder %s427_s30, %s581_s5 }
 0x254   :  { %p433_p11 = pnand %p431_p10, %p428_p9 }
 0x256   :  { %436 = shalt.err (!%p433_p11)
}
 0x257   :  { %242 = dma.vmem_to_hbm [thread:$0]  %s237_s28, 256, %s581_s5, [#allocation5], %s447_s9, %s447_s9, %s448_s10  }
 0x258   :  { %441 = dma.done.wait [#allocation5], 256  }
 0x259   :  { %442 = vsyncadd [#allocation5], 4294967040 }
 0x25a   :  { %443 = dma.done.wait [#allocation11], 256  }
 0x25b   :  { %444 = vsyncadd [#allocation11], 4294967040 }
 0x25c   :  { %261 = vsyncpa [#allocation4], 1 }
 0x25d   :  { %262 = vsyncpa [#allocation7], 1 }
 0x25e   :  { %263 = vsyncpa [#allocation5], 1 }
 0x25f   :  { %264 = vsyncpa [#allocation11], 1 }

</bundles_post_ra>
